<compile_context>
chip_gen: v7x
topology: tpu7x:2x2x1
jax: 0.10.0
libtpu: 0.0.40
codegen_flags: <defaults>
</compile_context>

<pallas_src>
from functools import partial

import jax
import jax.numpy as jnp
from jax import lax
from jax.experimental import pallas as pl
from jax.experimental.pallas import tpu as pltpu


def _top_re_eig_kernel(u_rows_ref, u_full_ref, w_ref, thr_ref, o_ref, *,
                       tm: int, d_valid: int):
    """One (TB, TM, Dp) output tile: u_rows diag(w) u_full^T + thr * I_rows.

    u_rows_ref: (TB, TM, Kp)  row tile of the top-K eigenvectors
    u_full_ref: (TB, Dp, Kp)  all rows of the top-K eigenvectors
                              (block index constant along the row grid axis)
    w_ref:      (TB, 1,  Kp)  rectified weights max(s_top - thr, 0), matmul dtype
    thr_ref:    (TB, 1,  1)   threshold (n-th largest eigenvalue), f32
    o_ref:      (TB, TM, Dp)  output tile
    """
    # Column scale of the row tile.  w is pre-cast in the wrapper, so this is a
    # native multiply (f32 by default; bf16 VALU on v6e/v7x for the bf16 path).
    scaled = u_rows_ref[...] * w_ref[...]                         # (TB, TM, Kp)
    # Batched NT contraction: contract the last axis of both operands so the
    # MXU is fed directly (no in-kernel transpose of u).  f32 accumulation.
    out = jnp.einsum("bik,bjk->bij", scaled, u_full_ref[...],
                     preferred_element_type=jnp.float32)          # (TB, TM, Dp)
    # Low-rank identity: u diag(max(s, thr)) u^T = thr*I + u_top diag(w) u_top^T
    # (uses u u^T = I).  Add thr on the diagonal of the valid (< D) region.
    dp = out.shape[-1]
    row0 = pl.program_id(1) * tm
    row = lax.broadcasted_iota(jnp.int32, (tm, dp), 0) + row0
    col = lax.broadcasted_iota(jnp.int32, (tm, dp), 1)
    diag = jnp.logical_and(row == col, col < d_valid)
    out = out + jnp.where(diag[None, :, :], thr_ref[...], jnp.float32(0.0))
    o_ref[...] = out.astype(o_ref.dtype)


def _vmem_capacity_bytes() -> int:
    """Per-TensorCore VMEM capacity; falls back to 64 MiB (v7x, conservative)."""
    try:
        info = pltpu.get_tpu_info()
        cap = getattr(info, "vmem_capacity_bytes", None)
        if cap:
            return int(cap)
    except Exception:  # best-effort hardware query
        pass
    return 64 << 20


def _choose_tiles(B: int, Dp: int, Kp: int, u_item: int, out_item: int,
                  vmem_cap: int):
    """Pick (TB, TM, vmem_limit_bytes) for grid = (B // TB, Dp // TM)."""
    small_vmem = vmem_cap <= (64 << 20)        # v7x-class part (also 2 TCs/chip)
    budget = (8 << 20) if small_vmem else (28 << 20)
    limit_cap = (48 << 20) if small_vmem else (100 << 20)

    def io_bytes(tb, tm):
        # row tile of u + resident full u + w + thr + output tile (single copy)
        return (tb * (tm * Kp + Dp * Kp + Kp) * u_item + tb * 4
                + tb * tm * Dp * out_item)

    def tmp_bytes(tb, tm):
        # in-kernel f32 temporaries: scaled rows, f32 accumulator, iota / mask
        return tb * tm * (Kp + Dp) * 4 + tm * Dp * 8

    def single_copy(tb, tm):
        return io_bytes(tb, tm) + tmp_bytes(tb, tm)

    # Row tile: multiple of 128 dividing Dp; prefer ~256, shrink to fit TB=1.
    tm_cands = [128 * k for k in range(1, Dp // 128 + 1) if Dp % (128 * k) == 0]
    pref = [t for t in tm_cands if t <= 256]
    TM = pref[-1] if pref else tm_cands[0]
    while single_copy(1, TM) > budget:
        smaller = [t for t in tm_cands if t < TM]
        if not smaller:
            break
        TM = smaller[-1]

    # Batch tile: largest divisor of B that fits the budget.  On 2-TC parts
    # keep at least 2 total grid steps when possible so both cores get work.
    TB = 1
    for tb in range(1, B + 1):
        if B % tb:
            continue
        if single_copy(tb, TM) > budget:
            break
        if small_vmem and (B // tb) * (Dp // TM) < 2 and B * (Dp // TM) >= 2:
            continue
        TB = tb

    # Double-buffered in/out + f32 temps + headroom, capped per chip generation.
    vmem_limit = int(min(limit_cap,
                         max(24 << 20,
                             2 * io_bytes(TB, TM) + tmp_bytes(TB, TM)
                             + (6 << 20))))
    return TB, TM, vmem_limit


def spd_top_re_eig(x: jax.Array, n: int, *,
                   matmul_dtype=jnp.float32, use_eigh: bool = True) -> jax.Array:
    """Forward of SPDTopReEig: u diag(max(s, s_n)) u^T for a batch of SPD x.

    matmul_dtype: MXU operand dtype (f32 default; bf16 only on v6e/v7x and only
    when a ~4e-3 relative error is acceptable).
    use_eigh: use eigh instead of SVD (identical for SPD inputs and much
    cheaper in XLA); set False to match the reference SVD path on non-SPD x.
    """
    B, D, D2 = x.shape
    assert D == D2, "input must be a batch of square SPD matrices"
    n = int(n)
    assert 0 <= n < D, f"n={n} must satisfy 0 <= n < D={D}"
    K = n + 1

    # TODO(synk): the eigendecomposition has no Pallas TPU primitive; it runs
    # in XLA.  Only the rectify + reconstruct hot path is a Pallas kernel.
    if use_eigh:
        s_all, u_all = jnp.linalg.eigh(x)            # ascending eigenvalues
        u_top = u_all[:, :, D - K:]                  # top-K eigenvectors
        s_top = s_all[:, D - K:]                     # top-K eigenvalues
        thr = s_all[:, D - 1 - n]                    # n-th largest
    else:
        u_all, s_all, _ = jnp.linalg.svd(x)          # descending singular values
        u_top = u_all[:, :, :K]
        s_top = s_all[:, :K]
        thr = s_all[:, n]

    # Rectification hoisted out of the kernel (O(B*D) work).
    w = jnp.maximum(s_top - thr[:, None], 0.0)       # (B, K), >= 0

    # Pad D and K to multiples of 128: lane-dense stores and full MXU tiles.
    # Zero-padded rows/columns of u_top and zero weights are exact no-ops.
    Dp = ((D + 127) // 128) * 128
    Kp = ((K + 127) // 128) * 128

    u_top = u_top.astype(matmul_dtype)
    w = w.reshape(B, 1, K).astype(matmul_dtype)
    thr_arr = thr.reshape(B, 1, 1).astype(jnp.float32)
    if Dp != D or Kp != K:
        u_top = jnp.pad(u_top, ((0, 0), (0, Dp - D), (0, Kp - K)))
    if Kp != K:
        w = jnp.pad(w, ((0, 0), (0, 0), (0, Kp - K)))

    out_dtype = x.dtype
    u_item = jnp.dtype(matmul_dtype).itemsize
    out_item = jnp.dtype(out_dtype).itemsize
    TB, TM, vmem_limit = _choose_tiles(B, Dp, Kp, u_item, out_item,
                                       _vmem_capacity_bytes())
    grid = (B // TB, Dp // TM)

    cost = pl.CostEstimate(
        flops=2 * B * Dp * Dp * Kp,
        transcendentals=0,
        bytes_accessed=(2 * B * Dp * Kp * u_item          # u_top: rows + resident
                        + B * Kp * u_item + B * 4         # w + thr
                        + B * Dp * Dp * out_item),        # output
    )

    kernel = partial(_top_re_eig_kernel, tm=TM, d_valid=D)
    out = pl.pallas_call(
        kernel,
        out_shape=jax.ShapeDtypeStruct((B, Dp, Dp), out_dtype),
        grid_spec=pltpu.PrefetchScalarGridSpec(
            num_scalar_prefetch=0,
            grid=grid,
            in_specs=[
                pl.BlockSpec((TB, TM, Kp), lambda b, r: (b, r, 0)),   # u row tile
                pl.BlockSpec((TB, Dp, Kp), lambda b, r: (b, 0, 0)),   # u full (resident over r)
                pl.BlockSpec((TB, 1, Kp), lambda b, r: (b, 0, 0)),    # rectified weights
                pl.BlockSpec((TB, 1, 1), lambda b, r: (b, 0, 0)),     # threshold
            ],
            out_specs=pl.BlockSpec((TB, TM, Dp), lambda b, r: (b, r, 0)),
        ),
        compiler_params=pltpu.CompilerParams(
            dimension_semantics=("parallel", "parallel"),
            vmem_limit_bytes=vmem_limit,
        ),
        cost_estimate=cost,
    )(u_top, u_top, w, thr_arr)

    if Dp != D:
        # TODO(synk): if the consumer can take the padded (B, Dp, Dp) result,
        # skip this slice to save an HBM pass (keep the padded store itself:
        # an unpadded out_shape would force masked vst.msk stores).
        out = out[:, :D, :D]
    return out


def _reference(x: jax.Array, n: int) -> jax.Array:
    u, s, _ = jnp.linalg.svd(x)
    thr = s[:, n][:, None]
    out_s = jnp.where(s >= thr, s, thr)
    return jnp.einsum("bij,bj,bkj->bik", u, out_s, u)


if __name__ == "__main__":
    key = jax.random.PRNGKey(0)
    B, D = 2, 16
    n = 3  # rectify everything below the 4th-largest eigenvalue

    a = jax.random.normal(key, (B, D, D), dtype=jnp.float32)
    # Build SPD inputs: A A^T / D + eps * I
    x = jnp.einsum("bij,bkj->bik", a, a) / D + 1e-3 * jnp.eye(D)[None]

    out = jax.block_until_ready(spd_top_re_eig(x, n))
    ref = _reference(x, n)
    assert out.shape == (B, D, D)
    assert jnp.allclose(out, ref, atol=1e-4, rtol=1e-4), (
        float(jnp.max(jnp.abs(out - ref))))

    print("KERNEL_OK")
</pallas_src>

<mosaic_0001>
module attributes {stable_mosaic.version = 11 : i64} {
  func.func @_top_re_eig_kernel(%arg0: i32, %arg1: i32, %arg2: memref<1x128x128xf32, #tpu.memory_space<vmem>>, %arg3: memref<1x128x128xf32, #tpu.memory_space<vmem>>, %arg4: memref<1x1x128xf32, #tpu.memory_space<vmem>>, %arg5: memref<1x1x1xf32, #tpu.memory_space<vmem>>, %arg6: memref<1x128x128xf32, #tpu.memory_space<vmem>>) attributes {dimension_semantics = [#tpu.dimension_semantics<parallel>, #tpu.dimension_semantics<parallel>], iteration_bounds = array<i64: 2, 1>, scalar_prefetch = 0 : i64, scratch_operands = 0 : i64, tpu.core_type = #tpu.core_type<tc>, window_params = [{transform_indices = @transform_0, window_bounds = array<i64: 1, 128, 128>}, {transform_indices = @transform_1, window_bounds = array<i64: 1, 128, 128>}, {transform_indices = @transform_2, window_bounds = array<i64: 1, 1, 128>}, {transform_indices = @transform_3, window_bounds = array<i64: 1, 1, 1>}, {transform_indices = @transform_4, window_bounds = array<i64: 1, 128, 128>}]} {
    %c0 = arith.constant 0 : index
    %c0_0 = arith.constant 0 : index
    %c0_1 = arith.constant 0 : index
    %0 = vector.load %arg2[%c0, %c0_0, %c0_1] : memref<1x128x128xf32, #tpu.memory_space<vmem>>, vector<1x128x128xf32>
    %c0_2 = arith.constant 0 : index
    %c0_3 = arith.constant 0 : index
    %c0_4 = arith.constant 0 : index
    %1 = vector.load %arg4[%c0_2, %c0_3, %c0_4] : memref<1x1x128xf32, #tpu.memory_space<vmem>>, vector<1x1x128xf32>
    %2 = vector.broadcast %1 : vector<1x1x128xf32> to vector<1x128x128xf32>
    %3 = arith.mulf %0, %2 : vector<1x128x128xf32>
    %c0_5 = arith.constant 0 : index
    %c0_6 = arith.constant 0 : index
    %c0_7 = arith.constant 0 : index
    %4 = vector.load %arg3[%c0_5, %c0_6, %c0_7] : memref<1x128x128xf32, #tpu.memory_space<vmem>>, vector<1x128x128xf32>
    "tpu.trace_start"() <{level = 10 : i32, message = "bik,bjk->bij"}> : () -> ()
    %cst = arith.constant dense<0.000000e+00> : vector<1x128x128xf32>
    %5 = tpu.matmul %3, %4, %cst {dimension_numbers = #tpu.dot_dimension_numbers<[2], [2], [1], [1], [0, 0, 0, 1, 1, 1], [0], [0]>} : vector<1x128x128xf32>, vector<1x128x128xf32>, vector<1x128x128xf32> -> vector<1x128x128xf32>
    "tpu.trace_stop"() : () -> ()
    %c128_i32 = arith.constant 128 : i32
    %6 = arith.muli %arg1, %c128_i32 : i32
    %7 = tpu.iota {dimensions = array<i32: 0>} : vector<128x128xi32>
    %8 = vector.broadcast %6 : i32 to vector<128x128xi32>
    %9 = arith.addi %7, %8 : vector<128x128xi32>
    %10 = tpu.iota {dimensions = array<i32: 1>} : vector<128x128xi32>
    %11 = arith.cmpi eq, %9, %10 : vector<128x128xi32>
    %c16_i32 = arith.constant 16 : i32
    %12 = vector.broadcast %c16_i32 : i32 to vector<128x128xi32>
    %13 = arith.cmpi slt, %10, %12 : vector<128x128xi32>
    %14 = arith.andi %11, %13 : vector<128x128xi1>
    %15 = vector.shape_cast %14 : vector<128x128xi1> to vector<1x128x128xi1>
    %c0_8 = arith.constant 0 : index
    %c0_9 = arith.constant 0 : index
    %c0_10 = arith.constant 0 : index
    %16 = vector.load %arg5[%c0_8, %c0_9, %c0_10] : memref<1x1x1xf32, #tpu.memory_space<vmem>>, vector<1x1x1xf32>
    %cst_11 = arith.constant 0.000000e+00 : f32
    %17 = vector.shape_cast %16 : vector<1x1x1xf32> to vector<1x1x1xf32>
    %18 = vector.broadcast %17 : vector<1x1x1xf32> to vector<1x128x128xf32>
    %19 = vector.broadcast %cst_11 : f32 to vector<1x128x128xf32>
    %20 = arith.select %15, %18, %19 : vector<1x128x128xi1>, vector<1x128x128xf32>
    %21 = arith.addf %5, %20 : vector<1x128x128xf32>
    %c0_12 = arith.constant 0 : index
    %c0_13 = arith.constant 0 : index
    %c0_14 = arith.constant 0 : index
    %22 = vector.load %arg6[%c0_12, %c0_13, %c0_14] : memref<1x128x128xf32, #tpu.memory_space<vmem>>, vector<1x128x128xf32>
    tpu.vector_store %arg6[%c0_12, %c0_13, %c0_14], %21 {strides = array<i32>} : memref<1x128x128xf32, #tpu.memory_space<vmem>>, vector<1x128x128xf32>,
    return
  }
  func.func @transform_0(%arg0: i32, %arg1: i32) -> (i32, i32, i32) {
    %c0_i32 = arith.constant 0 : i32
    %c0_i32_0 = arith.constant 0 : i32
    return %arg0, %arg1, %c0_i32 : i32, i32, i32
  }
  func.func @transform_1(%arg0: i32, %arg1: i32) -> (i32, i32, i32) {
    %c0_i32 = arith.constant 0 : i32
    %c0_i32_0 = arith.constant 0 : i32
    %c0_i32_1 = arith.constant 0 : i32
    return %arg0, %c0_i32, %c0_i32_0 : i32, i32, i32
  }
  func.func @transform_2(%arg0: i32, %arg1: i32) -> (i32, i32, i32) {
    %c0_i32 = arith.constant 0 : i32
    %c0_i32_0 = arith.constant 0 : i32
    %c0_i32_1 = arith.constant 0 : i32
    return %arg0, %c0_i32, %c0_i32_0 : i32, i32, i32
  }
  func.func @transform_3(%arg0: i32, %arg1: i32) -> (i32, i32, i32) {
    %c0_i32 = arith.constant 0 : i32
    %c0_i32_0 = arith.constant 0 : i32
    %c0_i32_1 = arith.constant 0 : i32
    return %arg0, %c0_i32, %c0_i32_0 : i32, i32, i32
  }
  func.func @transform_4(%arg0: i32, %arg1: i32) -> (i32, i32, i32) {
    %c0_i32 = arith.constant 0 : i32
    %c0_i32_0 = arith.constant 0 : i32
    return %arg0, %arg1, %c0_i32 : i32, i32, i32
  }
}

</mosaic_0001>

<bundles_post_ra>
// kernel: tpu_custom_call.1
= control target key start
LH: loop header
LB: loop body
LE: loop exit
PB: predicated region body
PF: predicated region fallthrough
CT: control target
= control target key end

     0   :  { %9 = vsyncpa [#allocation3], 0  ;;  %s1679_s0 = inlined_call_operand.hbm [shape: f32[2,128,128], index: 0, kind: input, shape index: {}]   ;;  %s1680_s1 = inlined_call_operand.hbm [shape: f32[2,128,128], index: 1, kind: input, shape index: {}]   ;;  %s1681_s2 = inlined_call_operand.vmem [shape: f32[2,1,128], index: 2, kind: input, shape index: {}]   ;;  %s1682_s3 = inlined_call_operand.vmem [shape: f32[2,1,1], index: 3, kind: input, shape index: {}]   ;;  %s1683_s4 = inlined_call_operand.hbm [shape: f32[2,128,128], index: 4, kind: output, shape index: {}]  }
   0x1   :  { %11 = vsyncpa [#allocation3 + $0x1], 0 }
   0x2   :  { %12 = vsyncpa [#allocation6], 0 }
   0x3   :  { %14 = vsyncpa [#allocation6 + $0x1], 0 }
   0x4   :  { %15 = vsyncpa [#allocation4], 0 }
   0x5   :  { %17 = vsyncpa [#allocation4 + $0x1], 0  ;;  %s1174_s15 = smov 0   ;;  %s1176_s16 = smov 0  }
   0x6   :  { %s1178_s17 = smov 0   ;;  %s1180_s18 = smov 0  }
   0x7   :  { %s1182_s19 = smov 0   ;;  %s1184_s20 = smov 0  }
   0x8 LB: > { %s760_s21 = sadd.s32 4294967295, %s1139_s20   ;;  %s761_s22 = sadd.s32 4294967294, %s1139_s20   ;;  %s1139_s20 = sphi %s1184_s20, %s23_s20   ;;  %s1135_s19 = sphi %s1182_s19, %s1735_s19   ;;  %s1131_s18 = sphi %s1180_s18, %s1734_s18   ;;  %s1127_s17 = sphi %s1178_s17, %s1733_s17   ;;  %s1123_s16 = sphi %s1176_s16, %s1732_s16   ;;  %s1119_s15 = sphi %s1174_s15, %s1731_s15  }
   0x9   : > { %s35_s23 = sadd.s32 1, %s1135_s19  ;;  %s44_s24 = sadd.s32 1, %s1127_s17 }
   0xa   : > { %p37_p0 = scmp.ge.s32.totalorder %s35_s23, 2  ;;  %p51_p1 = scmp.ne.s32.totalorder %s1127_s17, %s1123_s16 }
   0xb   : > { %p52_p2 = scmp.eq.s32.totalorder %s1139_s20, 0  ;;  %p57_p3 = scmp.ne.s32.totalorder %s1123_s16, %s1119_s15 }
   0xc   : > { %s1737_s23 = smov (%p37_p0, %s35_s23), 0  ;;  %p58_p5 = scmp.eq.s32.totalorder %s760_s21, 0 }
   0xd   : > { %p1215_p4 = por %p52_p2, %p51_p1  ;;  %s39_s26 = ssub.s32 %s1135_s19, %s1737_s23 }
   0xe   : > { %p161_p6 = scmp.eq.s32.totalorder %s760_s21, 1  ;;  %p42_p7 = scmp.eq.s32.totalorder %s39_s26, 0 }
   0xf   : > { %p1221_p8 = por %p58_p5, %p57_p3  ;;  %p167_p10 = scmp.eq.s32.totalorder %s761_s22, 1 }
  0x10   : > { %p1225_p9 = por %p161_p6, %p51_p1  ;;  %p937_p13 = scmp.lt.s32.totalorder %s1139_s20, 2 }
  0x11   : > { %s1688_s27 = scalar_select %p1221_p8, 1, 0 }
  0x12   : > { %s1689_s28 = scalar_select %p1225_p9, 1, 0 }
  0x13   : > { %s1230_s29 = scalar_select %p42_p7, %s1127_s17, %s44_s24  }
  0x14   : > { %p1232_p11 = por %p167_p10, %p57_p3  ;;  %s1239_s5 = sand.u32 1, %s1127_s17  }
  0x15   : > { %s764_s6 = sshll.u32 %s1239_s5, 7  ;;  %s781_s7 = sshll.u32 %s1135_s19, 11 }
  0x16   : > { %s1690_s30 = scalar_select %p1232_p11, 1, 0 }
  0x17   : > { %s1248_s10 = scalar_lea.hbm %s1679_s0, %s781_s7  ;;  %s191_s11 = scalar_lea.vmem [#allocation2], %s764_s6 }
  0x18   : > { %s200_s12 = sshll.u32 %s191_s11, 4  ;;  %p1256_p0 = pnand %p937_p13, %p1215_p4  ;;  %s1252_s12 = int_to_ptr.vmem [resolvable:$true] %s200_s12 }
  0x19   : > { %s188_s14 = scalar_lea.sflag [#allocation3], %s1239_s5  ;;  %s993_s21 = scalar_lea.hbm %s1248_s10, 2048 }
  0x1a   : > { %p994_p2 = scmp.ne.s32.totalorder %s1248_s10, %s993_s21  ;;  %p995_p3 = pneg %p1256_p0 }
  0x1b   : > { %s998_s25 = scalar_lea.hbm %s1679_s0, 4096  ;;  %p999_p4 = scmp.lt.u32.totalorder %s1248_s10, %s1679_s0 }
  0x1c   : > { %p996_p5 = pnand %p995_p3, %p994_p2  ;;  %p1000_p7 = scmp.lt.u32.totalorder %s998_s25, %s993_s21 }
  0x1d   : > { %p1002_p13 = scmp.lt.u32.totalorder %s993_s21, %s1248_s10 }
  0x1e   : > { %p997_p6 = pneg %p996_p5  ;;  %p1001_p10 = por %p1000_p7, %p999_p4 }
  0x20   : > { %p1003_p12 = por %p1002_p13, %p1001_p10 }
  0x22   : > { %p1004_p1 = pnand %p1003_p12, %p997_p6 }
  0x24   : > { %1007 = shalt.err (!%p1004_p1)
}
  0x25   : > { %s1008_s9 = scalar_lea.vmem %s1252_s12, 2048  ;;  %s1141_s11 = smov [#allocation2]  }
  0x26   : > { %p1009_p2 = scmp.ne.s32.totalorder %s1252_s12, %s1008_s9  ;;  %s1013_s22 = sshll.u32 %s1141_s11, 4  ;;  %s1014_s22 = int_to_ptr.vmem [resolvable:$false] %s1013_s22 }
  0x27   : > { %s1015_s24 = scalar_lea.vmem %s1014_s22, 4096  ;;  %p1016_p9 = scmp.lt.s32.totalorder %s1252_s12, %s1014_s22 }
  0x28   : > { %p1011_p5 = pnand %p1009_p2, %p995_p3  ;;  %p1017_p4 = scmp.lt.s32.totalorder %s1015_s24, %s1008_s9 }
  0x2a   : > { %p1012_p11 = pneg %p1011_p5  ;;  %p1018_p7 = por %p1017_p4, %p1016_p9 }
  0x2c   : > { %p1019_p10 = pnand %p1018_p7, %p1012_p11 }
  0x2e   : > { %1022 = shalt.err (!%p1019_p10)
}
  0x2f   : > { %s1685_s21 = smov 128   ;;  %s1143_s25 = smov 8  }
  0x30   : > { %929 = dma.hbm_to_vmem [thread:$0]  (!%p1256_p0), %s1248_s10, 2048, %s1252_s12, %s188_s14, %s1685_s21, %s1685_s21, %s1143_s25  }
  0x31   : > { %p241_p9 = scmp.lt.s32.totalorder %s1139_s20, 3  ;;  %s1298_s9 = scalar_lea.hbm %s1680_s1, %s781_s7 }
  0x32   : > { %p1692_p11 = scmp.ge.s32.totalorder %s1139_s20, 1  ;;  %s214_s22 = scalar_lea.vmem [#allocation5], %s764_s6 }
  0x33   : > { %s221_s24 = sshll.u32 %s214_s22, 4  ;;  %s211_s10 = scalar_lea.sflag [#allocation6], %s1239_s5  ;;  %s1308_s24 = int_to_ptr.vmem [resolvable:$true] %s221_s24 }
  0x34   : > { %p1302_p12 = pnand %p1692_p11, %p241_p9  ;;  %s1023_s12 = scalar_lea.hbm %s1298_s9, 2048 }
  0x35   : > { %p1024_p1 = scmp.ne.s32.totalorder %s1298_s9, %s1023_s12  ;;  %s1028_s26 = scalar_lea.hbm %s1680_s1, 4096 }
  0x36   : > { %p1029_p2 = scmp.lt.u32.totalorder %s1298_s9, %s1680_s1  ;;  %p1030_p5 = scmp.lt.u32.totalorder %s1028_s26, %s1023_s12 }
  0x37   : > { %p1026_p6 = pnand %p1024_p1, %p995_p3  ;;  %p1032_p7 = scmp.lt.u32.totalorder %s1023_s12, %s1298_s9 }
  0x38   : > { %p1031_p4 = por %p1030_p5, %p1029_p2 }
  0x39   : > { %p1027_p13 = pneg %p1026_p6 }
  0x3a   : > { %p1033_p10 = por %p1032_p7, %p1031_p4 }
  0x3c   : > { %p1034_p9 = pnand %p1033_p10, %p1027_p13 }
  0x3e   : > { %1037 = shalt.err (!%p1034_p9)
}
  0x3f   : > { %s1038_s6 = scalar_lea.vmem %s1308_s24, 2048  ;;  %s1144_s22 = smov [#allocation5]  }
  0x40   : > { %p1039_p11 = scmp.ne.s32.totalorder %s1308_s24, %s1038_s6  ;;  %s1043_s7 = sshll.u32 %s1144_s22, 4  ;;  %s1044_s7 = int_to_ptr.vmem [resolvable:$false] %s1043_s7 }
  0x41   : > { %s1045_s21 = scalar_lea.vmem %s1044_s7, 4096  ;;  %p1046_p8 = scmp.lt.s32.totalorder %s1308_s24, %s1044_s7 }
  0x42   : > { %p1041_p1 = pnand %p1039_p11, %p995_p3  ;;  %p1047_p2 = scmp.lt.s32.totalorder %s1045_s21, %s1038_s6 }
  0x44   : > { %p1042_p6 = pneg %p1041_p1  ;;  %p1048_p5 = por %p1047_p2, %p1046_p8 }
  0x46   : > { %p1049_p4 = pnand %p1048_p5, %p1042_p6 }
  0x48   : > { %1052 = shalt.err (!%p1049_p4)
}
  0x49   : > { %s1694_s12 = smov 128   ;;  %245 = sbr.rel (%p1302_p12) target bundleno = 392 (0x188), region = 36 }
  0x4a   : > { %932 = dma.hbm_to_vmem [thread:$0]  (!%p1256_p0), %s1298_s9, 2048, %s1308_s24, %s211_s10, %s1694_s12, %s1694_s12, %s1143_s25  }
  0x4b   : > { %s1342_s14 = sand.u32 (!%p1302_p12), 1, %s1123_s16   ;;  %p1695_p8 = scmp.ne.s32.totalorder (!%p1302_p12), %s1688_s27, 0 }
  0x4c   : > { %s1345_s26 = sshll.u32 (!%p1302_p12), %s1342_s14, 7  ;;  %s248_s13 = scalar_lea.sflag (!%p1302_p12), [#allocation3], %s1342_s14 }
  0x4d   : > { %s1349_s8 = scalar_lea.vmem (!%p1302_p12), [#allocation2], %s1345_s26 }
  0x50   : > { %1106 = dma.done.wait (%p1695_p8), %s248_s13, 2048  }
  0x51   : > { %1108 = vsyncadd (%p1695_p8), %s248_s13, 4294965248  ;;  %s257_s5 = scalar_lea.sflag [#allocation6], %s1342_s14  ;;  %s1357_s25 = scalar_lea.vmem [#allocation5], %s1345_s26 }
  0x52   : > { %1110 = dma.done.wait (%p1695_p8), %s257_s5, 2048  }
  0x53   : > { %1112 = vsyncadd (%p1695_p8), %s257_s5, 4294965248  ;;  %p297_p0 = scmp.lt.s32.totalorder %s1131_s18, 1  ;;  %v1145_v0 = vmov 0   ;;  %v343_v1 = vld [vmem:[%s1357_s25] sm:$0xff]  ;;  %v344_v2 = vld [vmem:[%s1357_s25 + $0x8] sm:$0xff]  ;;  %v360_v59 = vlaneseq  ;;  %s1524_s7 = scalar_lea.vmem [#allocation7], %s1345_s26 }
  0x54   : > { %992 = vset.pattern.permute.xlu0 %v1145_v0  ;;  %v345_v3 = vld [vmem:[%s1357_s25 + $0x10] sm:$0xff]  ;;  %v872_v4 = vpack.c.bf16 %v344_v2, %v343_v1  ;;  %v346_v5 = vld [vmem:[%s1357_s25 + $0x18] sm:$0xff]  ;;  %v304_v7 = vld [vmem:[%s1349_s8] sm:$0xff]  ;;  %s783_s21 = sshll.u32 %s1131_s18, 11  ;;  %s632_s12 = sshll.u32 %s1524_s7, 4  ;;  %s1626_s12 = int_to_ptr.vmem [resolvable:$true] %s632_s12 }
  0x55   : > { %s298_s9 = scalar_select %p297_p0, %s1131_s18, 1  ;;  %v876_v6 = vpack.c.bf16 %v346_v5, %v345_v3  ;;  %v347_v9 = vld [vmem:[%s1357_s25 + $0x20] sm:$0xff]  ;;  %v348_v10 = vld [vmem:[%s1357_s25 + $0x28] sm:$0xff]  ;;  %v349_v16 = vld [vmem:[%s1357_s25 + $0x30] sm:$0xff]  ;;  %v361_v60 = vshrl.u32 %v360_v59, 7  ;;  %v1421_v62 = vand.u32 127, %v360_v59 }
  0x56   : > { %873 = vmatprep.subr.bf16.mxu0 %v872_v4  ;;  %904 = vmatprep.subr.bf16.mxu1 %v872_v4  ;;  %v312_v12 = vld [vmem:[%s1349_s8 + $0x40] sm:$0xff]  ;;  %v880_v14 = vpack.c.bf16 %v348_v10, %v347_v9  ;;  %v350_v17 = vld [vmem:[%s1357_s25 + $0x38] sm:$0xff]  ;;  %v352_v20 = vld [vmem:[%s1357_s25 + $0x48] sm:$0xff]  ;;  %s1624_s13 = scalar_lea.hbm %s1683_s4, %s783_s21  ;;  %s1053_s5 = scalar_lea.vmem %s1626_s12, 2048 }
  0x57   : > { %s299_s24 = scalar_lea.vmem %s1681_s2, %s298_s9  ;;  %875 = vmatpush3.bf16.xpose.msra.mxu0 %v872_v4  ;;  %912 = vmatpush3.bf16.xpose.msra.mxu1 %v872_v4  ;;  %s302_s22 = scalar_lea.vmem %s1682_s3, %s298_s9  ;;  %v884_v18 = vpack.c.bf16 %v350_v17, %v349_v16  ;;  %v351_v19 = vld [vmem:[%s1357_s25 + $0x40] sm:$0xff]  ;;  %v353_v22 = vld [vmem:[%s1357_s25 + $0x50] sm:$0xff]  ;;  %v354_v23 = vld [vmem:[%s1357_s25 + $0x58] sm:$0xff]  ;;  %v362_v61 = vadd.s32 8, %v361_v60  ;;  %v370_v63 = vadd.s32 72, %v361_v60  ;;  %v369_v0 = vadd.s32 64, %v361_v60 }
  0x58   : > { %877 = vmatprep.subr.bf16.mxu0 %v876_v6  ;;  %905 = vmatprep.subr.bf16.mxu1 %v876_v6  ;;  %v1373_v8 = vld [vmem:[%s299_s24] ss:$0 sm:$0xff]  ;;  %v888_v21 = vpack.c.bf16 %v352_v20, %v351_v19  ;;  %v892_v24 = vpack.c.bf16 %v354_v23, %v353_v22  ;;  %v356_v26 = vld [vmem:[%s1357_s25 + $0x68] sm:$0xff]  ;;  %v357_v28 = vld [vmem:[%s1357_s25 + $0x70] sm:$0xff]  ;;  %vm412_vm1 = vcmp.lt.s32.totalorder %v1421_v62, 16  ;;  %v364_v1 = vadd.s32 24, %v361_v60  ;;  %p1054_p3 = scmp.ne.s32.totalorder %s1626_s12, %s1053_s5 }
  0x59   : > { %v327_v11 = vmul.f32 %v1373_v8, %v304_v7  ;;  %v335_v13 = vmul.f32 %v1373_v8, %v312_v12  ;;  %v775_v15 = vld [vmem:[%s302_s22] ss:$0 sm:$0xff]  ;;  %v358_v29 = vld [vmem:[%s1357_s25 + $0x78] sm:$0xff]  ;;  %v305_v31 = vld [vmem:[%s1349_s8 + $0x8] sm:$0xff]  ;;  %vm397_vm0 = vcmp.eq.s32.totalorder %v362_v61, %v1421_v62  ;;  %vm405_vm2 = vcmp.eq.s32.totalorder %v370_v63, %v1421_v62  ;;  %p1728_p12 = scmp.ne.s32.totalorder %s1689_s28, 0 }
  0x5a   : > { %436 = vperm.xlu0 %992, %v775_v15   ;;  %v355_v25 = vld [vmem:[%s1357_s25 + $0x60] sm:$0xff]  ;;  %v900_v30 = vpack.c.bf16 %v358_v29, %v357_v28  ;;  %v313_v32 = vld [vmem:[%s1349_s8 + $0x48] sm:$0xff]  ;;  %v306_v33 = vld [vmem:[%s1349_s8 + $0x10] sm:$0xff]  ;;  %v328_v35 = vmul.f32 %v1373_v8, %v305_v31  ;;  %v372_v2 = vadd.s32 88, %v361_v60  ;;  %vm396_vm3 = vcmp.eq.s32.totalorder %v361_v60, %v1421_v62  ;;  %s1146_s25 = smov [#allocation7]  }
  0x5b   : > { %848 = vmatprep.mubr.f32.mxu0 %v327_v11  ;;  %860 = vmatprep.mubr.f32.mxu1 %v335_v13  ;;  %v896_v27 = vpack.c.bf16 %v356_v26, %v355_v25  ;;  %v314_v34 = vld [vmem:[%s1349_s8 + $0x50] sm:$0xff]  ;;  %v336_v36 = vmul.f32 %v1373_v8, %v313_v32  ;;  %v329_v37 = vmul.f32 %v1373_v8, %v306_v33  ;;  %v307_v39 = vld [vmem:[%s1349_s8 + $0x18] sm:$0xff]  ;;  %v308_v41 = vld [vmem:[%s1349_s8 + $0x20] sm:$0xff]  ;;  %v363_v3 = vadd.s32 16, %v361_v60  ;;  %p1055_p13 = pnand %p1054_p3, %p1728_p12  ;;  %s1057_s9 = sshll.u32 %s1146_s25, 4  ;;  %s1058_s9 = int_to_ptr.vmem [resolvable:$false] %s1057_s9 }
  0x5c   : > { %v337_v38 = vmul.f32 %v1373_v8, %v314_v34  ;;  %v315_v40 = vld [vmem:[%s1349_s8 + $0x58] sm:$0xff]  ;;  %v316_v42 = vld [vmem:[%s1349_s8 + $0x60] sm:$0xff]  ;;  %v330_v43 = vmul.f32 %v1373_v8, %v307_v39  ;;  %v331_v45 = vmul.f32 %v1373_v8, %v308_v41  ;;  %v309_v47 = vld [vmem:[%s1349_s8 + $0x28] sm:$0xff]  ;;  %vm404_vm5 = vcmp.eq.s32.totalorder %v369_v0, %v1421_v62  ;;  %s1059_s27 = scalar_lea.vmem %s1058_s9, 4096  ;;  %p1060_p10 = scmp.lt.s32.totalorder %s1626_s12, %s1058_s9 }
  0x5d   : > { %v338_v44 = vmul.f32 %v1373_v8, %v315_v40  ;;  %v339_v46 = vmul.f32 %v1373_v8, %v316_v42  ;;  %v317_v48 = vld [vmem:[%s1349_s8 + $0x68] sm:$0xff]  ;;  %v310_v49 = vld [vmem:[%s1349_s8 + $0x30] sm:$0xff]  ;;  %v332_v51 = vmul.f32 %v1373_v8, %v309_v47  ;;  %v311_v55 = vld [vmem:[%s1349_s8 + $0x38] sm:$0xff]  ;;  %v371_v5 = vadd.s32 80, %v361_v60  ;;  %p1056_p7 = pneg %p1055_p13  ;;  %p1061_p9 = scmp.lt.s32.totalorder %s1059_s27, %s1053_s5 }
  0x5e   : > { %v318_v50 = vld [vmem:[%s1349_s8 + $0x70] sm:$0xff]  ;;  %v340_v52 = vmul.f32 %v1373_v8, %v317_v48  ;;  %v333_v53 = vmul.f32 %v1373_v8, %v310_v49  ;;  %v319_v56 = vld [vmem:[%s1349_s8 + $0x78] sm:$0xff]  ;;  %v334_v57 = vmul.f32 %v1373_v8, %v311_v55  ;;  %vm1429_vm4 = vmand %vm397_vm0, %vm412_vm1  ;;  %vm399_vm7 = vcmp.eq.s32.totalorder %v364_v1, %v1421_v62  ;;  %s617_s8 = scalar_lea.sflag [#allocation4], %s1342_s14 }
  0x5f   : > { %879 = vmatpush3.bf16.xpose.msra.mxu0 %v876_v6  ;;  %913 = vmatpush3.bf16.xpose.msra.mxu1 %v876_v6  ;;  %v341_v54 = vmul.f32 %v1373_v8, %v318_v50  ;;  %v342_v58 = vmul.f32 %v1373_v8, %v319_v56  ;;  %vm1436_vm6 = vmand %vm405_vm2, %vm412_vm1  ;;  %v366_v7 = vadd.s32 40, %v361_v60  ;;  %vm407_vm9 = vcmp.eq.s32.totalorder %v372_v2, %v1421_v62  ;;  %p1062_p11 = por %p1061_p9, %p1060_p10 }
  0x60   : > { %881 = vmatprep.subr.bf16.mxu0 %v880_v14  ;;  %906 = vmatprep.subr.bf16.mxu1 %v880_v14  ;;  %vm1445_vm8 = vmand %vm396_vm3, %vm412_vm1  ;;  %v374_v10 = vadd.s32 104, %v361_v60  ;;  %vm398_vm11 = vcmp.eq.s32.totalorder %v363_v3, %v1421_v62  ;;  %v365_v12 = vadd.s32 32, %v361_v60  ;;  %vm406_vm13 = vcmp.eq.s32.totalorder %v371_v5, %v1421_v62 }
  0x61   : > { %vm1452_vm10 = vmand %vm404_vm5, %vm412_vm1  ;;  %vm401_vm15 = vcmp.eq.s32.totalorder %v366_v7, %v1421_v62  ;;  %v376_v22 = vadd.s32 120, %v361_v60  ;;  %v375_v33 = vadd.s32 112, %v361_v60  ;;  %p1063_p1 = pnand %p1062_p11, %p1056_p7 }
  0x62   : > { %vm1459_vm12 = vmand %vm399_vm7, %vm412_vm1  ;;  %vm409_vm2 = vcmp.eq.s32.totalorder %v374_v10, %v1421_v62 }
  0x63   : > { %vm1472_vm14 = vmand %vm407_vm9, %vm412_vm1 }
  0x64   : > { %vm1485_vm0 = vmand %vm398_vm11, %vm412_vm1 }
  0x65   : > { %vm1497_vm3 = vmand %vm406_vm13, %vm412_vm1 }
  0x66   : > { %vm1506_vm5 = vmand %vm401_vm15, %vm412_vm1 }
  0x67   : > { %883 = vmatpush3.bf16.xpose.msra.mxu0 %v880_v14  ;;  %914 = vmatpush3.bf16.xpose.msra.mxu1 %v880_v14  ;;  %v373_v14 = vadd.s32 96, %v361_v60  ;;  %vm1518_vm7 = vmand %vm409_vm2, %vm412_vm1 }
  0x68   : > { %885 = vmatprep.subr.bf16.mxu0 %v884_v18  ;;  %907 = vmatprep.subr.bf16.mxu1 %v884_v18 }
  0x6f   : > { %887 = vmatpush3.bf16.xpose.msra.mxu0 %v884_v18  ;;  %915 = vmatpush3.bf16.xpose.msra.mxu1 %v884_v18  ;;  %v368_v18 = vadd.s32 56, %v361_v60 }
  0x70   : > { %889 = vmatprep.subr.bf16.mxu0 %v888_v21  ;;  %908 = vmatprep.subr.bf16.mxu1 %v888_v21 }
  0x77   : > { %891 = vmatpush3.bf16.xpose.msra.mxu0 %v888_v21  ;;  %916 = vmatpush3.bf16.xpose.msra.mxu1 %v888_v21 }
  0x78   : > { %893 = vmatprep.subr.bf16.mxu0 %v892_v24  ;;  %909 = vmatprep.subr.bf16.mxu1 %v892_v24 }
  0x7f   : > { %895 = vmatpush3.bf16.xpose.msra.mxu0 %v892_v24  ;;  %917 = vmatpush3.bf16.xpose.msra.mxu1 %v892_v24 }
  0x80   : > { %897 = vmatprep.subr.bf16.mxu0 %v896_v27  ;;  %910 = vmatprep.subr.bf16.mxu1 %v896_v27 }
  0x87   : > { %899 = vmatpush3.bf16.xpose.msra.mxu0 %v896_v27  ;;  %918 = vmatpush3.bf16.xpose.msra.mxu1 %v896_v27  ;;  %v367_v27 = vadd.s32 48, %v361_v60 }
  0x88   : > { %901 = vmatprep.subr.bf16.mxu0 %v900_v30  ;;  %911 = vmatprep.subr.bf16.mxu1 %v900_v30 }
  0x8f   : > { %903 = vmatpush3.bf16.xpose.msra.mxu0 %v900_v30  ;;  %919 = vmatpush3.bf16.xpose.msra.mxu1 %v900_v30 }
  0x96   : > { %849 = vmatmul.mubr.f32.vlgmr.msra.gmra.mrb[0].mxu0 %v328_v35  ;;  %861 = vmatmul.mubr.f32.vlgmr.msra.gmra.mrb[0].mxu1 %v336_v36 }
  0x97   : > { %851 = vmatprep.mubr.f32.mxu0 %v329_v37  ;;  %863 = vmatprep.mubr.f32.mxu1 %v337_v38 }
  0x9a   : > { %852 = vmatmul.mubr.f32.gmra.mrb[2].mxu0 %v330_v43  ;;  %864 = vmatmul.mubr.f32.gmra.mrb[2].mxu1 %v338_v44 }
  0x9b   : > { %854 = vmatprep.mubr.f32.mxu0 %v331_v45  ;;  %866 = vmatprep.mubr.f32.mxu1 %v339_v46 }
  0x9e   : > { %855 = vmatmul.mubr.f32.gmra.mrb[4].mxu0 %v332_v51  ;;  %867 = vmatmul.mubr.f32.gmra.mrb[4].mxu1 %v340_v52 }
  0x9f   : > { %857 = vmatprep.mubr.f32.mxu0 %v333_v53  ;;  %869 = vmatprep.mubr.f32.mxu1 %v341_v54 }
  0xa2   : > { %858 = vmatmul.mubr.f32.gmra.mrb[6].mxu0 %v334_v57  ;;  %870 = vmatmul.mubr.f32.gmra.mrb[6].mxu1 %v342_v58 }
  0xd9   : > { %v1441_v8 = vpop.permute.xlu0 %436 }
  0xda   : > { %v440_v15 = vsel %vm1429_vm4, %v1441_v8, 0.0  ;;  %v448_v16 = vsel %vm1436_vm6, %v1441_v8, 0.0  ;;  %v439_v19 = vsel %vm1445_vm8, %v1441_v8, 0.0  ;;  %v447_v20 = vsel %vm1452_vm10, %v1441_v8, 0.0 }
  0xdb   : > { %v442_v25 = vsel %vm1459_vm12, %v1441_v8, 0.0  ;;  %vm400_vm4 = vcmp.eq.s32.totalorder %v365_v12, %v1421_v62  ;;  %vm408_vm6 = vcmp.eq.s32.totalorder %v373_v14, %v1421_v62  ;;  %v450_v36 = vsel %vm1472_vm14, %v1441_v8, 0.0 }
  0xdc   : > { %vm403_vm8 = vcmp.eq.s32.totalorder %v368_v18, %v1421_v62  ;;  %v441_v38 = vsel %vm1485_vm0, %v1441_v8, 0.0  ;;  %v449_v39 = vsel %vm1497_vm3, %v1441_v8, 0.0  ;;  %vm1538_vm9 = vmand %vm400_vm4, %vm412_vm1  ;;  %vm411_vm10 = vcmp.eq.s32.totalorder %v376_v22, %v1421_v62 }
  0xdd   : > { %vm1549_vm11 = vmand %vm408_vm6, %vm412_vm1  ;;  %vm402_vm12 = vcmp.eq.s32.totalorder %v367_v27, %v1421_v62  ;;  %vm410_vm14 = vcmp.eq.s32.totalorder %v375_v33, %v1421_v62  ;;  %v444_v51 = vsel %vm1506_vm5, %v1441_v8, 0.0  ;;  %v452_v52 = vsel %vm1518_vm7, %v1441_v8, 0.0 }
  0xde   : > { %vm1558_vm13 = vmand %vm403_vm8, %vm412_vm1  ;;  %v443_v54 = vsel %vm1538_vm9, %v1441_v8, 0.0  ;;  %v451_v55 = vsel %vm1549_vm11, %v1441_v8, 0.0 }
  0xdf   : > { %vm1573_vm15 = vmand %vm411_vm10, %vm412_vm1  ;;  %v446_v3 = vsel %vm1558_vm13, %v1441_v8, 0.0 }
  0xe0   : > { %vm1589_vm0 = vmand %vm402_vm12, %vm412_vm1  ;;  %v454_v62 = vsel %vm1573_vm15, %v1441_v8, 0.0 }
  0xe1   : > { %vm1599_vm2 = vmand %vm410_vm14, %vm412_vm1  ;;  %v445_v4 = vsel %vm1589_vm0, %v1441_v8, 0.0 }
  0xe2   : > { %v453_v5 = vsel %vm1599_vm2, %v1441_v8, 0.0 }
 0x169   : > { %v850_v23 = vpop.f32.mrb[0].mxu0  ;;  %v862_v24 = vpop.f32.mrb[0].mxu1 }
 0x16a   : > { %v527_v28 = vadd.f32 %v850_v23, %v440_v15  ;;  %v567_v29 = vadd.f32 %v862_v24, %v448_v16  ;;  %v521_v30 = vpop.f32.mrb[1].mxu0  ;;  %v561_v31 = vpop.f32.mrb[1].mxu1 }
 0x16b   : > { %v522_v34 = vadd.f32 %v521_v30, %v439_v19  ;;  %v562_v35 = vadd.f32 %v561_v31, %v447_v20 }
 0x16c   : > { %601 = vst [vmem:[%s1524_s7 + $0x8] sm:$0xff] %v527_v28  ;;  %609 = vst [vmem:[%s1524_s7 + $0x48] sm:$0xff] %v567_v29 }
 0x16d   : > { %600 = vst [vmem:[%s1524_s7] sm:$0xff] %v522_v34  ;;  %608 = vst [vmem:[%s1524_s7 + $0x40] sm:$0xff] %v562_v35  ;;  %v853_v41 = vpop.f32.mrb[2].mxu0  ;;  %v865_v42 = vpop.f32.mrb[2].mxu1 }
 0x16e   : > { %v537_v44 = vadd.f32 %v853_v41, %v442_v25  ;;  %v577_v45 = vadd.f32 %v865_v42, %v450_v36  ;;  %v531_v46 = vpop.f32.mrb[3].mxu0  ;;  %v571_v47 = vpop.f32.mrb[3].mxu1 }
 0x16f   : > { %v532_v49 = vadd.f32 %v531_v46, %v441_v38  ;;  %v572_v50 = vadd.f32 %v571_v47, %v449_v39 }
 0x170   : > { %603 = vst [vmem:[%s1524_s7 + $0x18] sm:$0xff] %v537_v44  ;;  %611 = vst [vmem:[%s1524_s7 + $0x58] sm:$0xff] %v577_v45 }
 0x171   : > { %602 = vst [vmem:[%s1524_s7 + $0x10] sm:$0xff] %v532_v49  ;;  %610 = vst [vmem:[%s1524_s7 + $0x50] sm:$0xff] %v572_v50  ;;  %v856_v57 = vpop.f32.mrb[4].mxu0  ;;  %v868_v58 = vpop.f32.mrb[4].mxu1 }
 0x172   : > { %v547_v60 = vadd.f32 %v856_v57, %v444_v51  ;;  %v587_v61 = vadd.f32 %v868_v58, %v452_v52  ;;  %v541_v63 = vpop.f32.mrb[5].mxu0  ;;  %v581_v0 = vpop.f32.mrb[5].mxu1 }
 0x173   : > { %v542_v1 = vadd.f32 %v541_v63, %v443_v54  ;;  %v582_v2 = vadd.f32 %v581_v0, %v451_v55 }
 0x174   : > { %605 = vst [vmem:[%s1524_s7 + $0x28] sm:$0xff] %v547_v60  ;;  %613 = vst [vmem:[%s1524_s7 + $0x68] sm:$0xff] %v587_v61 }
 0x175   : > { %604 = vst [vmem:[%s1524_s7 + $0x20] sm:$0xff] %v542_v1  ;;  %612 = vst [vmem:[%s1524_s7 + $0x60] sm:$0xff] %v582_v2  ;;  %v859_v6 = vpop.f32.mrb[6].mxu0  ;;  %v871_v7 = vpop.f32.mrb[6].mxu1 }
 0x176   : > { %v557_v9 = vadd.f32 %v859_v6, %v446_v3  ;;  %v597_v10 = vadd.f32 %v871_v7, %v454_v62  ;;  %v551_v11 = vpop.f32.mrb[7].mxu0  ;;  %v591_v12 = vpop.f32.mrb[7].mxu1 }
 0x177   : > { %v552_v8 = vadd.f32 %v551_v11, %v445_v4  ;;  %v592_v13 = vadd.f32 %v591_v12, %v453_v5 }
 0x178   : > { %607 = vst [vmem:[%s1524_s7 + $0x38] sm:$0xff] %v557_v9  ;;  %615 = vst [vmem:[%s1524_s7 + $0x78] sm:$0xff] %v597_v10 }
 0x179   : > { %606 = vst [vmem:[%s1524_s7 + $0x30] sm:$0xff] %v552_v8  ;;  %614 = vst [vmem:[%s1524_s7 + $0x70] sm:$0xff] %v592_v13 }
 0x17a   : > { %1066 = shalt.err (!%p1063_p1)
}
 0x17b   : > { %s1067_s11 = scalar_lea.hbm %s1624_s13, 2048  ;;  %s1071_s6 = scalar_lea.hbm %s1683_s4, 4096 }
 0x17c   : > { %p1068_p6 = scmp.ne.s32.totalorder %s1624_s13, %s1067_s11  ;;  %p1072_p4 = scmp.lt.u32.totalorder %s1624_s13, %s1683_s4 }
 0x17d   : > { %p1073_p8 = scmp.lt.u32.totalorder %s1071_s6, %s1067_s11  ;;  %p1075_p3 = scmp.lt.u32.totalorder %s1067_s11, %s1624_s13 }
 0x17e   : > { %p1069_p2 = pnand %p1068_p6, %p1728_p12 }
 0x17f   : > { %p1074_p0 = por %p1073_p8, %p1072_p4 }
 0x180   : > { %p1070_p5 = pneg %p1069_p2 }
 0x181   : > { %p1076_p13 = por %p1075_p3, %p1074_p0 }
 0x183   : > { %p1077_p7 = pnand %p1076_p13, %p1070_p5 }
 0x185   : > { %1080 = shalt.err (!%p1077_p7)
}
 0x186   : > { %s1147_s21 = smov 128   ;;  %s1148_s18 = smov 8  }
 0x187   : > { %924 = dma.vmem_to_hbm [thread:$0]  (%p1728_p12), %s1626_s12, 2048, %s1624_s13, %s617_s8, %s1147_s21, %s1147_s21, %s1148_s18  }
 0x188 PF: > { %s647_s26 = sand.u32 1, %s1119_s15   ;;  %p1729_p10 = scmp.ne.s32.totalorder %s1690_s30, 0 }
 0x189   : > { %p1730_p9 = scmp.ge.s32.totalorder %s1139_s20, 2  ;;  %s648_s5 = scalar_lea.sflag [#allocation4], %s647_s26 }
 0x18b   : > { %p934_p11 = pnand %p1730_p9, %p1729_p10 }
 0x18d   : > { %1114 = dma.done.wait (!%p934_p11), %s648_s5, 2048  }
 0x18e   : > { %1116 = vsyncadd (!%p934_p11), %s648_s5, 4294965248  ;;  %s23_s20 = sadd.s32 1, %s1139_s20   ;;  %s1731_s15 = smov %s1123_s16 }
 0x18f   : > { %p20_p1 = scmp.ge.s32.totalorder %s23_s20, 4   ;;  %s1732_s16 = smov %s1127_s17 }
 0x190   : > { %s1733_s17 = smov %s1230_s29  ;;  %s1734_s18 = smov %s1135_s19 }
 0x191   : > { %s1735_s19 = smov %s1737_s23  ;;  %22 = sbr.rel (!%p20_p1) target bundleno = 8 (0x8), region = 100 }
 0x198   :  { %653 = vsyncpa [#allocation3], 1 }
 0x199   :  { %655 = vsyncpa [#allocation3 + $0x1], 1 }
 0x19a   :  { %656 = vsyncpa [#allocation6], 1 }
 0x19b   :  { %658 = vsyncpa [#allocation6 + $0x1], 1 }
 0x19c   :  { %659 = vsyncpa [#allocation4], 1 }
 0x19d   :  { %661 = vsyncpa [#allocation4 + $0x1], 1 }

</bundles_post_ra>
